<compile_context>
chip_gen: v7x
topology: tpu7x:2x2x1
jax: 0.10.0
libtpu: 0.0.40
codegen_flags: <defaults>
</compile_context>

<pallas_src>
import jax
import jax.numpy as jnp
from jax.experimental import pallas as pl
from jax.experimental.pallas import tpu as pltpu


def _model_kernel(params_ref, x_ref, o_ref):
    # params_ref: SMEM (6,) f32 = [w00, w01, w10, w11, b0+off, b1+off]
    #             (torch [out, in] weight order, offset already folded in bias)
    # x_ref / o_ref: VMEM (2, T) — features on sublanes, batch on the lane axis.
    x0 = x_ref[0:1, :]                     # (1, T)
    x1 = x_ref[1:2, :]                     # (1, T)

    w00 = params_ref[0]
    w01 = params_ref[1]
    w10 = params_ref[2]
    w11 = params_ref[3]
    b0 = params_ref[4]
    b1 = params_ref[5]

    # y[j, :] = W[j,0]*x0 + W[j,1]*x1 + b'[j]  -- pure VPU scalar-broadcast FMAs,
    # written as two full-lane sublane-row stores (no concat, no masked vst).
    o_ref[0:1, :] = (x0 * w00 + x1 * w01 + b0).astype(o_ref.dtype)
    o_ref[1:2, :] = (x0 * w10 + x1 * w11 + b1).astype(o_ref.dtype)


def model_forward(x, w1, b1, w2, b2, *, lane_tile=16384):
    B, F = x.shape
    assert F == 2

    # Parameter-only fusion (folds under jit): ln1 + ln2 = x @ (W1+W2).T + (b1+b2).
    w = (w1 + w2).astype(jnp.float32)                      # (2, 2) torch [out, in]

    # Hoisted data-dependent branch: global-sum sign computed once as a scalar
    # pre-pass (f32 accumulation) and folded into the fused bias. This keeps
    # the batch-tiled kernel exactly equivalent to the reference.
    off = jnp.where(jnp.sum(x.astype(jnp.float32)) < 0,
                    jnp.float32(1.0), jnp.float32(-1.0))
    b = (b1 + b2).astype(jnp.float32) + off                # (2,)
    params = jnp.concatenate([w.reshape(-1), b])           # (6,) SMEM scalars

    # Lane-dense layout: batch on the 128-lane axis, padded to a tile multiple.
    T = min(int(lane_tile), pl.cdiv(B, 128) * 128)         # tile, multiple of 128
    Bp = pl.cdiv(B, T) * T
    xt = x.T                                               # (2, B)
    if Bp != B:
        xt = jnp.pad(xt, ((0, 0), (0, Bp - B)))            # (2, Bp)

    out_t = pl.pallas_call(
        _model_kernel,
        out_shape=jax.ShapeDtypeStruct((2, Bp), x.dtype),
        grid=(Bp // T,),
        in_specs=[
            pl.BlockSpec(memory_space=pltpu.MemorySpace.SMEM),   # fused params
            pl.BlockSpec((2, T), lambda i: (0, i)),              # x tile (lane-dense)
        ],
        out_specs=pl.BlockSpec((2, T), lambda i: (0, i)),
        compiler_params=pltpu.CompilerParams(
            dimension_semantics=("parallel",)),
    )(params, xt)

    return out_t[:, :B].T                                   # back to (B, 2)


def _reference(x, w1, b1, w2, b2):
    ln1 = x @ w1.T + b1
    ln2 = x @ w2.T + b2
    off = jnp.where(jnp.sum(x) < 0, 1.0, -1.0)
    return ln1 + ln2 + off


if __name__ == "__main__":
    key = jax.random.PRNGKey(0)
    kx, kx2, k1, k2, k3, k4 = jax.random.split(key, 6)

    # Deterministic parameter init (torch Linear(2, 2) shapes / bounds).
    bound = 1.0 / (2.0 ** 0.5)
    w1 = jax.random.uniform(k1, (2, 2), jnp.float32, -bound, bound)
    b1 = jax.random.uniform(k2, (2,), jnp.float32, -bound, bound)
    w2 = jax.random.uniform(k3, (2, 2), jnp.float32, -bound, bound)
    b2 = jax.random.uniform(k4, (2,), jnp.float32, -bound, bound)

    # Small input consistent with Linear(2, 2): batch=8, features=2.
    x = jax.random.normal(kx, (8, 2), jnp.float32)

    fwd = jax.jit(model_forward)
    out = jax.block_until_ready(fwd(x, w1, b1, w2, b2))
    ref = _reference(x, w1, b1, w2, b2)
    assert out.shape == (8, 2)
    assert jnp.allclose(out, ref, atol=1e-5, rtol=1e-5), "mismatch vs reference"

    # Also exercise the multi-tile grid path (grid=3) with a small tile.
    x_big = jax.random.normal(kx2, (300, 2), jnp.float32)
    fwd_tiled = jax.jit(lambda *a: model_forward(*a, lane_tile=128))
    out_big = jax.block_until_ready(fwd_tiled(x_big, w1, b1, w2, b2))
    ref_big = _reference(x_big, w1, b1, w2, b2)
    assert out_big.shape == (300, 2)
    assert jnp.allclose(out_big, ref_big, atol=1e-5, rtol=1e-5), "tiled mismatch"

    print("KERNEL_OK")
</pallas_src>

<mosaic_0001>
module attributes {stable_mosaic.version = 11 : i64} {
  func.func @_model_kernel(%arg0: i32, %arg1: memref<6xf32, #tpu.memory_space<smem>>, %arg2: memref<2x128xf32, #tpu.memory_space<vmem>>, %arg3: memref<2x128xf32, #tpu.memory_space<vmem>>) attributes {dimension_semantics = [#tpu.dimension_semantics<parallel>], iteration_bounds = array<i64: 1>, scalar_prefetch = 0 : i64, scratch_operands = 0 : i64, tpu.core_type = #tpu.core_type<tc>, window_params = [{transform_indices = @transform_0, window_bounds = array<i64: 6>}, {transform_indices = @transform_1, window_bounds = array<i64: 2, 128>}, {transform_indices = @transform_2, window_bounds = array<i64: 2, 128>}]} {
    %c0 = arith.constant 0 : index
    %c0_0 = arith.constant 0 : index
    %0 = vector.load %arg2[%c0, %c0_0] : memref<2x128xf32, #tpu.memory_space<vmem>>, vector<1x128xf32>
    %c1 = arith.constant 1 : index
    %c0_1 = arith.constant 0 : index
    %1 = vector.load %arg2[%c1, %c0_1] : memref<2x128xf32, #tpu.memory_space<vmem>>, vector<1x128xf32>
    %c0_2 = arith.constant 0 : index
    %2 = memref.load %arg1[%c0_2] : memref<6xf32, #tpu.memory_space<smem>>
    %c1_3 = arith.constant 1 : index
    %3 = memref.load %arg1[%c1_3] : memref<6xf32, #tpu.memory_space<smem>>
    %c2 = arith.constant 2 : index
    %4 = memref.load %arg1[%c2] : memref<6xf32, #tpu.memory_space<smem>>
    %c3 = arith.constant 3 : index
    %5 = memref.load %arg1[%c3] : memref<6xf32, #tpu.memory_space<smem>>
    %c4 = arith.constant 4 : index
    %6 = memref.load %arg1[%c4] : memref<6xf32, #tpu.memory_space<smem>>
    %c5 = arith.constant 5 : index
    %7 = memref.load %arg1[%c5] : memref<6xf32, #tpu.memory_space<smem>>
    %8 = vector.broadcast %2 : f32 to vector<1x128xf32>
    %9 = arith.mulf %0, %8 : vector<1x128xf32>
    %10 = vector.broadcast %3 : f32 to vector<1x128xf32>
    %11 = arith.mulf %1, %10 : vector<1x128xf32>
    %12 = arith.addf %9, %11 : vector<1x128xf32>
    %13 = vector.broadcast %6 : f32 to vector<1x128xf32>
    %14 = arith.addf %12, %13 : vector<1x128xf32>
    %c0_4 = arith.constant 0 : index
    %c0_5 = arith.constant 0 : index
    %15 = vector.load %arg3[%c0_4, %c0_5] : memref<2x128xf32, #tpu.memory_space<vmem>>, vector<1x128xf32>
    tpu.vector_store %arg3[%c0_4, %c0_5], %14 {strides = array<i32>} : memref<2x128xf32, #tpu.memory_space<vmem>>, vector<1x128xf32>,
    %16 = vector.broadcast %4 : f32 to vector<1x128xf32>
    %17 = arith.mulf %0, %16 : vector<1x128xf32>
    %18 = vector.broadcast %5 : f32 to vector<1x128xf32>
    %19 = arith.mulf %1, %18 : vector<1x128xf32>
    %20 = arith.addf %17, %19 : vector<1x128xf32>
    %21 = vector.broadcast %7 : f32 to vector<1x128xf32>
    %22 = arith.addf %20, %21 : vector<1x128xf32>
    %c1_6 = arith.constant 1 : index
    %c0_7 = arith.constant 0 : index
    %23 = vector.load %arg3[%c1_6, %c0_7] : memref<2x128xf32, #tpu.memory_space<vmem>>, vector<1x128xf32>
    tpu.vector_store %arg3[%c1_6, %c0_7], %22 {strides = array<i32>} : memref<2x128xf32, #tpu.memory_space<vmem>>, vector<1x128xf32>,
    return
  }
  func.func @transform_0(%arg0: i32) -> i32 {
    %c0_i32 = arith.constant 0 : i32
    %c0_i32_0 = arith.constant 0 : i32
    return %c0_i32 : i32
  }
  func.func @transform_1(%arg0: i32) -> (i32, i32) {
    %c0_i32 = arith.constant 0 : i32
    %c0_i32_0 = arith.constant 0 : i32
    return %c0_i32, %arg0 : i32, i32
  }
  func.func @transform_2(%arg0: i32) -> (i32, i32) {
    %c0_i32 = arith.constant 0 : i32
    %c0_i32_0 = arith.constant 0 : i32
    return %c0_i32, %arg0 : i32, i32
  }
}

</mosaic_0001>

<bundles_post_ra>
// kernel: model_forward.1
= control target key start
LH: loop header
LB: loop body
LE: loop exit
PB: predicated region body
PF: predicated region fallthrough
CT: control target
= control target key end

     0   :  { %7 = vsyncpa [#allocation3], 0  ;;  %s104_s0 = inlined_call_operand.vmem [shape: f32[6], index: 0, kind: input, shape index: {}]   ;;  %s105_s1 = inlined_call_operand.vmem [shape: f32[2,128], index: 1, kind: input, shape index: {}]   ;;  %s106_s2 = inlined_call_operand.vmem [shape: f32[2,128], index: 2, kind: output, shape index: {}]  }
   0x1   :  { %s14_s11 = sshll.u32 %s104_s0, 4  ;;  %s15_s11 = int_to_ptr.vmem [resolvable:$true] %s14_s11 }
   0x2   :  { %s59_s12 = scalar_lea.vmem %s15_s11, 16  ;;  %p64_p1 = scmp.lt.s32.totalorder %s15_s11, %s15_s11 }
   0x3   :  { %p60_p0 = scmp.ne.s32.totalorder %s15_s11, %s59_s12  ;;  %p65_p2 = scmp.lt.s32.totalorder %s59_s12, %s59_s12 }
   0x5   :  { %p66_p3 = por %p65_p2, %p64_p1 }
   0x7   :  { %p67_p4 = pnand %p66_p3, %p60_p0 }
   0x9   :  { %70 = shalt.err (!%p67_p4)
}
   0xa   :  { %s73_s13 = smov [#allocation2]  }
   0xb   :  { %17 = dma.vmem_to_smem %s15_s11, 16, %s73_s13, [#allocation3]  }
   0xc   :  { %71 = dma.done.wait [#allocation3], 16  }
   0xd   :  { %72 = vsyncadd [#allocation3], 4294967280 }
   0xe   :  { %23 = sfence }
   0xf   :  { %s26_s14 = sld [smem:[#allocation2]]  ;;  %s53_s15 = sld [smem:[#allocation2 + $0x1]]  ;;  %v24_v0 = vld [vmem:[%s105_s1] sm:$0x1]  ;;  %v25_v1 = vld [vmem:[%s105_s1 + $0x1] sm:$0x1] }
  0x10   :  { %s56_s16 = sld [smem:[#allocation2 + $0x4]]  ;;  %s54_s17 = sld [smem:[#allocation2 + $0x2]] }
  0x11   :  { %s55_s18 = sld [smem:[#allocation2 + $0x3]]  ;;  %s57_s19 = sld [smem:[#allocation2 + $0x5]] }
  0x15   :  { %v32_v2 = vstv %s26_s14  ;;  %v34_v4 = vstv %s53_s15 }
  0x16   :  { %v33_v3 = vmul.f32 %v32_v2, %v24_v0  ;;  %v35_v5 = vmul.f32 %v34_v4, %v25_v1  ;;  %v40_v6 = vstv %s54_s17  ;;  %v37_v8 = vstv %s56_s16 }
  0x17   :  { %v42_v7 = vstv %s55_s18  ;;  %v41_v9 = vmul.f32 %v40_v6, %v24_v0  ;;  %v45_v12 = vstv %s57_s19 }
  0x18   :  { %v43_v10 = vmul.f32 %v42_v7, %v25_v1  ;;  %v36_v11 = vadd.f32 %v35_v5, %v33_v3 }
  0x1a   :  { %v44_v13 = vadd.f32 %v43_v10, %v41_v9  ;;  %v38_v14 = vadd.f32 %v37_v8, %v36_v11 }
  0x1c   :  { %v46_v15 = vadd.f32 %v45_v12, %v44_v13  ;;  %39 = vst [vmem:[%s106_s2] sm:$0x1] %v38_v14 }
  0x1e   :  { %47 = vst [vmem:[%s106_s2 + $0x1] sm:$0x1] %v46_v15 }
  0x1f   :  { %52 = vsyncpa [#allocation3], 1 }

</bundles_post_ra>
